<compile_context>
chip_gen: v7x
topology: tpu7x:2x2x1
jax: 0.10.0
libtpu: 0.0.40
codegen_flags: <defaults>
</compile_context>

<pallas_src>
import functools

import jax
import jax.numpy as jnp
from jax.experimental import pallas as pl
from jax.experimental.pallas import tpu as pltpu


_LANE = 128
_SUBLANE = 8


def _round_up(x, m):
    return ((x + m - 1) // m) * m


def _choose_tiling(batch, target_block=256):
    """Pick (block_m, padded_batch).

    Prefer `target_block`-row tiles (fills the 256-wide MXU on v6e/v7x); for smaller
    batches split into two tiles when possible so the "parallel" batch axis can
    shard across v7x's two TensorCores; tiny batches use a single tile.
    """
    b_ceil = _round_up(max(batch, 1), _SUBLANE)
    if b_ceil >= 2 * target_block:
        block_m = target_block
    elif b_ceil >= 2 * _SUBLANE:
        block_m = _round_up(-(-b_ceil // 2), _SUBLANE)  # -> at least 2 grid steps
    else:
        block_m = b_ceil
    b_pad = _round_up(b_ceil, block_m)
    return block_m, b_pad


# --------------------------------------------------------------------------- kernels


def _rnn_kernel_single_layer(x_ref, w0_ref, wout_ref, o_ref):
    # h = tanh(x @ W_ih0^T)   (biases zero, recurrent term zero)
    h = jnp.tanh(
        jnp.dot(x_ref[...], w0_ref[...], preferred_element_type=jnp.float32)
    )
    o_ref[...] = jnp.dot(
        h.astype(jnp.bfloat16), wout_ref[...], preferred_element_type=jnp.float32
    ).astype(o_ref.dtype)


def _rnn_kernel_streamed(x_ref, w0_ref, wrest_ref, wout_ref, o_ref, h_ref):
    """Grid = (batch_tiles, num_layers); one (H_pad, H_pad) layer slab per step."""
    l = pl.program_id(1)
    last = pl.num_programs(1) - 1

    @pl.when(l == 0)
    def _():
        # Layer 0: h = tanh(x @ W_ih0^T)
        h_ref[...] = jnp.tanh(
            jnp.dot(x_ref[...], w0_ref[...], preferred_element_type=jnp.float32)
        )

    @pl.when(l > 0)
    def _():
        # Layer l: h = tanh(h @ W_ihl^T), current layer slab streamed into VMEM.
        h_ref[...] = jnp.tanh(
            jnp.dot(
                h_ref[...].astype(jnp.bfloat16),
                wrest_ref[0],
                preferred_element_type=jnp.float32,
            )
        )

    @pl.when(l == last)
    def _():
        # Final Linear on h_n[-1]; lane-dense (block_m, O_pad) slab -> unmasked vst.
        o_ref[...] = jnp.dot(
            h_ref[...].astype(jnp.bfloat16),
            wout_ref[...],
            preferred_element_type=jnp.float32,
        ).astype(o_ref.dtype)


# ---------------------------------------------------------------------------- params


def _xavier_uniform(key, shape):
    """Match torch.nn.init.xavier_uniform_ for a 2D (fan_out, fan_in) weight."""
    fan_out, fan_in = shape
    bound = (6.0 / (fan_in + fan_out)) ** 0.5
    return jax.random.uniform(key, shape, jnp.float32, -bound, bound)


def init_params(key, input_size, hidden_size, num_layers, output_size):
    """Weights pre-transposed, zero-padded to lane-dense slabs, and cast to bf16."""
    h_pad = _round_up(hidden_size, _LANE)
    o_pad = _round_up(output_size, _LANE)
    keys = jax.random.split(key, num_layers + 1)

    # Layer 0 W_ih: (hidden, input), xavier-uniform (as in the module).
    w_ih0 = _xavier_uniform(keys[0], (hidden_size, input_size))
    w0_t = (
        jnp.zeros((input_size, h_pad), jnp.float32)
        .at[:, :hidden_size]
        .set(w_ih0.T)
        .astype(jnp.bfloat16)
    )
    params = {"w_ih0_t": w0_t}  # (I, H_pad) bf16

    # Layers >= 1 W_ih: (hidden, hidden), each a dense (H_pad, H_pad) bf16 slab.
    if num_layers > 1:
        slabs = []
        for l in range(1, num_layers):
            w = _xavier_uniform(keys[l], (hidden_size, hidden_size))
            slabs.append(
                jnp.zeros((h_pad, h_pad), jnp.float32)
                .at[:hidden_size, :hidden_size]
                .set(w.T)
            )
        params["w_ih_rest_t"] = jnp.stack(slabs, 0).astype(jnp.bfloat16)  # (L-1,Hp,Hp)

    w_out = _xavier_uniform(keys[num_layers], (output_size, hidden_size))
    params["w_out_t"] = (
        jnp.zeros((h_pad, o_pad), jnp.float32)
        .at[:hidden_size, :output_size]
        .set(w_out.T)
        .astype(jnp.bfloat16)
    )  # (H_pad, O_pad) bf16

    # NOTE: all RNN/Linear biases are zero-initialized by the module, and weight_hh
    # (orthogonal init) never affects this forward (seq_len == 1, h0 == 0), so none
    # of them are materialized or DMA'd.
    return params


# --------------------------------------------------------------------------- forward


@functools.partial(jax.jit, static_argnames=("num_layers", "output_size"))
def rnn_forward(x, params, *, num_layers, output_size):
    batch, input_size = x.shape
    h_pad, o_pad = params["w_out_t"].shape

    block_m, b_pad = _choose_tiling(batch)
    nb = b_pad // block_m

    # Pad only batch rows (cheap); the lane dim keeps the true input_size via the
    # full-array-dim exception to the (8, 128) block rule (MXU pads K internally).
    x_p = jnp.pad(x.astype(jnp.bfloat16), ((0, b_pad - batch), (0, 0)))

    # Rough per-step VMEM footprint -> explicit scoped-VMEM limit with headroom.
    footprint = (
        input_size * h_pad * 2                               # w0 (single-buffered)
        + ((h_pad * h_pad * 2) * 2 if num_layers > 1 else 0)  # streamed slab x2 bufs
        + h_pad * o_pad * 2                                  # wout (single-buffered)
        + block_m * input_size * 2 * 2                       # x tile x2 bufs
        + block_m * o_pad * 4 * 2                            # out tile x2 bufs
        + block_m * h_pad * 4                                # h scratch
    )
    vmem_limit = int(min(max(1.5 * footprint, 32 << 20), 100 << 20))

    flops = 2 * b_pad * (
        input_size * h_pad + (num_layers - 1) * h_pad * h_pad + h_pad * o_pad
    )
    bytes_accessed = (
        b_pad * input_size * 2
        + input_size * h_pad * 2
        + (num_layers - 1) * h_pad * h_pad * 2
        + h_pad * o_pad * 2
        + b_pad * o_pad * 4
    )
    cost = pl.CostEstimate(
        flops=flops,
        transcendentals=b_pad * h_pad * num_layers,
        bytes_accessed=bytes_accessed,
    )

    if num_layers == 1:
        grid = (nb,)
        in_specs = [
            pl.BlockSpec((block_m, input_size), lambda i: (i, 0)),
            pl.BlockSpec((input_size, h_pad), lambda i: (0, 0),
                         pipeline_mode=pl.Buffered(1)),
            pl.BlockSpec((h_pad, o_pad), lambda i: (0, 0),
                         pipeline_mode=pl.Buffered(1)),
        ]
        operands = (x_p, params["w_ih0_t"], params["w_out_t"])
        out_specs = pl.BlockSpec((block_m, o_pad), lambda i: (i, 0))
        scratch_shapes = []
        kernel = _rnn_kernel_single_layer
        dim_sem = ("parallel",)
    else:
        grid = (nb, num_layers)
        in_specs = [
            pl.BlockSpec((block_m, input_size), lambda i, l: (i, 0)),
            pl.BlockSpec((input_size, h_pad), lambda i, l: (0, 0),
                         pipeline_mode=pl.Buffered(1)),
            # Stream one (H_pad, H_pad) layer slab per step (default double buffer:
            # layer l+1's weight DMA overlaps layer l's matmul). Layer l consumes
            # rest-slab l-1; l == 0 points at slab 0 (same block as l == 1, no
            # extra DMA) and ignores it.
            pl.BlockSpec((1, h_pad, h_pad),
                         lambda i, l: (jnp.maximum(l - 1, 0), 0, 0)),
            pl.BlockSpec((h_pad, o_pad), lambda i, l: (0, 0),
                         pipeline_mode=pl.Buffered(1)),
        ]
        operands = (x_p, params["w_ih0_t"], params["w_ih_rest_t"],
                    params["w_out_t"])
        out_specs = pl.BlockSpec((block_m, o_pad), lambda i, l: (i, 0))
        scratch_shapes = [pltpu.VMEM((block_m, h_pad), jnp.float32)]
        kernel = _rnn_kernel_streamed
        dim_sem = ("parallel", "arbitrary")

    out = pl.pallas_call(
        kernel,
        out_shape=jax.ShapeDtypeStruct((b_pad, o_pad), jnp.float32),
        grid=grid,
        in_specs=in_specs,
        out_specs=out_specs,
        scratch_shapes=scratch_shapes,
        compiler_params=pltpu.CompilerParams(
            dimension_semantics=dim_sem,
            vmem_limit_bytes=vmem_limit,
        ),
        cost_estimate=cost,
    )(*operands)

    # Un-pad, then match the PyTorch forward's trailing `.squeeze()`.
    return jnp.squeeze(out[:batch, :output_size])


if __name__ == "__main__":
    input_size, hidden_size, num_layers, output_size = 16, 32, 2, 8
    batch = 2

    key = jax.random.PRNGKey(0)
    k_param, k_x = jax.random.split(key)
    params = init_params(k_param, input_size, hidden_size, num_layers, output_size)
    x = jax.random.normal(k_x, (batch, input_size), jnp.float32)

    y = rnn_forward(x, params, num_layers=num_layers, output_size=output_size)
    jax.block_until_ready(y)
    assert y.shape == (batch, output_size), y.shape

    # Pure-JAX reference mirroring the kernel math (bf16 weights/activations into
    # each matmul, f32 accumulation, f32 tanh); biases are zero by construction.
    hi = jax.lax.Precision.HIGHEST
    f32 = jnp.float32
    x_bf = x.astype(jnp.bfloat16).astype(f32)
    w0 = params["w_ih0_t"][:, :hidden_size].astype(f32)
    h_ref = jnp.tanh(jnp.dot(x_bf, w0, precision=hi))
    for l in range(1, num_layers):
        wl = params["w_ih_rest_t"][l - 1, :hidden_size, :hidden_size].astype(f32)
        h_ref = jnp.tanh(
            jnp.dot(h_ref.astype(jnp.bfloat16).astype(f32), wl, precision=hi)
        )
    w_out = params["w_out_t"][:hidden_size, :output_size].astype(f32)
    y_ref = jnp.dot(h_ref.astype(jnp.bfloat16).astype(f32), w_out, precision=hi)
    assert jnp.allclose(y, y_ref, atol=5e-3, rtol=5e-3), float(
        jnp.max(jnp.abs(y - y_ref))
    )

    print("KERNEL_OK")
</pallas_src>

<mosaic_0001>
module attributes {stable_mosaic.version = 11 : i64} {
  func.func @_rnn_kernel_streamed(%arg0: i32, %arg1: i32, %arg2: memref<8x16xbf16, #tpu.memory_space<vmem>>, %arg3: memref<16x128xbf16, #tpu.memory_space<vmem>>, %arg4: memref<1x128x128xbf16, #tpu.memory_space<vmem>>, %arg5: memref<128x128xbf16, #tpu.memory_space<vmem>>, %arg6: memref<8x128xf32, #tpu.memory_space<vmem>>, %arg7: memref<8x128xf32, #tpu.memory_space<vmem>>) attributes {dimension_semantics = [#tpu.dimension_semantics<parallel>, #tpu.dimension_semantics<arbitrary>], iteration_bounds = array<i64: 1, 2>, scalar_prefetch = 0 : i64, scratch_operands = 1 : i64, tpu.core_type = #tpu.core_type<tc>, window_params = [{transform_indices = @transform_0, window_bounds = array<i64: 8, 16>}, {pipeline_mode = #tpu.pipeline_mode<synchronous>, transform_indices = @transform_1, window_bounds = array<i64: 16, 128>}, {transform_indices = @transform_2, window_bounds = array<i64: 1, 128, 128>}, {pipeline_mode = #tpu.pipeline_mode<synchronous>, transform_indices = @transform_3, window_bounds = array<i64: 128, 128>}, {transform_indices = @transform_4, window_bounds = array<i64: 8, 128>}]} {
    %c0_i32 = arith.constant 0 : i32
    %0 = arith.cmpi eq, %arg1, %c0_i32 : i32
    %1 = arith.extui %0 : i1 to i32
    %c0_i32_0 = arith.constant 0 : i32
    %2 = arith.cmpi ne, %1, %c0_i32_0 : i32
    scf.if %2 {
      %c0 = arith.constant 0 : index
      %c0_4 = arith.constant 0 : index
      %9 = vector.load %arg2[%c0, %c0_4] : memref<8x16xbf16, #tpu.memory_space<vmem>>, vector<8x16xbf16>
      %c0_5 = arith.constant 0 : index
      %c0_6 = arith.constant 0 : index
      %10 = vector.load %arg3[%c0_5, %c0_6] : memref<16x128xbf16, #tpu.memory_space<vmem>>, vector<16x128xbf16>
      %cst = arith.constant dense<0.000000e+00> : vector<8x128xf32>
      %11 = tpu.matmul %9, %10, %cst {dimension_numbers = #tpu.dot_dimension_numbers<[1], [0], [0], [1], [0, 0, 1, 1], [], []>} : vector<8x16xbf16>, vector<16x128xbf16>, vector<8x128xf32> -> vector<8x128xf32>
      %12 = math.tanh %11 : vector<8x128xf32>
      %c0_7 = arith.constant 0 : index
      %c0_8 = arith.constant 0 : index
      %13 = vector.load %arg7[%c0_7, %c0_8] : memref<8x128xf32, #tpu.memory_space<vmem>>, vector<8x128xf32>
      tpu.vector_store %arg7[%c0_7, %c0_8], %12 {strides = array<i32>} : memref<8x128xf32, #tpu.memory_space<vmem>>, vector<8x128xf32>,
    } else {
    }
    %c0_i32_1 = arith.constant 0 : i32
    %3 = arith.cmpi sgt, %arg1, %c0_i32_1 : i32
    %4 = arith.extui %3 : i1 to i32
    %c0_i32_2 = arith.constant 0 : i32
    %5 = arith.cmpi ne, %4, %c0_i32_2 : i32
    scf.if %5 {
      %c0 = arith.constant 0 : index
      %c0_4 = arith.constant 0 : index
      %9 = vector.load %arg7[%c0, %c0_4] : memref<8x128xf32, #tpu.memory_space<vmem>>, vector<8x128xf32>
      %10 = arith.truncf %9 : vector<8x128xf32> to vector<8x128xbf16>
      %c0_5 = arith.constant 0 : index
      %c0_6 = arith.constant 0 : index
      %c0_7 = arith.constant 0 : index
      %11 = vector.load %arg4[%c0_5, %c0_6, %c0_7] : memref<1x128x128xbf16, #tpu.memory_space<vmem>>, vector<1x128x128xbf16>
      %12 = vector.shape_cast %11 : vector<1x128x128xbf16> to vector<128x128xbf16>
      %cst = arith.constant dense<0.000000e+00> : vector<8x128xf32>
      %13 = tpu.matmul %10, %12, %cst {dimension_numbers = #tpu.dot_dimension_numbers<[1], [0], [0], [1], [0, 0, 1, 1], [], []>} : vector<8x128xbf16>, vector<128x128xbf16>, vector<8x128xf32> -> vector<8x128xf32>
      %14 = math.tanh %13 : vector<8x128xf32>
      %c0_8 = arith.constant 0 : index
      %c0_9 = arith.constant 0 : index
      %15 = vector.load %arg7[%c0_8, %c0_9] : memref<8x128xf32, #tpu.memory_space<vmem>>, vector<8x128xf32>
      tpu.vector_store %arg7[%c0_8, %c0_9], %14 {strides = array<i32>} : memref<8x128xf32, #tpu.memory_space<vmem>>, vector<8x128xf32>,
    } else {
    }
    %c1_i32 = arith.constant 1 : i32
    %6 = arith.cmpi eq, %arg1, %c1_i32 : i32
    %7 = arith.extui %6 : i1 to i32
    %c0_i32_3 = arith.constant 0 : i32
    %8 = arith.cmpi ne, %7, %c0_i32_3 : i32
    scf.if %8 {
      %c0 = arith.constant 0 : index
      %c0_4 = arith.constant 0 : index
      %9 = vector.load %arg7[%c0, %c0_4] : memref<8x128xf32, #tpu.memory_space<vmem>>, vector<8x128xf32>
      %10 = arith.truncf %9 : vector<8x128xf32> to vector<8x128xbf16>
      %c0_5 = arith.constant 0 : index
      %c0_6 = arith.constant 0 : index
      %11 = vector.load %arg5[%c0_5, %c0_6] : memref<128x128xbf16, #tpu.memory_space<vmem>>, vector<128x128xbf16>
      %cst = arith.constant dense<0.000000e+00> : vector<8x128xf32>
      %12 = tpu.matmul %10, %11, %cst {dimension_numbers = #tpu.dot_dimension_numbers<[1], [0], [0], [1], [0, 0, 1, 1], [], []>} : vector<8x128xbf16>, vector<128x128xbf16>, vector<8x128xf32> -> vector<8x128xf32>
      %c0_7 = arith.constant 0 : index
      %c0_8 = arith.constant 0 : index
      %13 = vector.load %arg6[%c0_7, %c0_8] : memref<8x128xf32, #tpu.memory_space<vmem>>, vector<8x128xf32>
      tpu.vector_store %arg6[%c0_7, %c0_8], %12 {strides = array<i32>} : memref<8x128xf32, #tpu.memory_space<vmem>>, vector<8x128xf32>,
    } else {
    }
    return
  }
  func.func @transform_0(%arg0: i32, %arg1: i32) -> (i32, i32) {
    %c0_i32 = arith.constant 0 : i32
    %c0_i32_0 = arith.constant 0 : i32
    return %arg0, %c0_i32 : i32, i32
  }
  func.func @transform_1(%arg0: i32, %arg1: i32) -> (i32, i32) {
    %c0_i32 = arith.constant 0 : i32
    %c0_i32_0 = arith.constant 0 : i32
    %c0_i32_1 = arith.constant 0 : i32
    return %c0_i32, %c0_i32_0 : i32, i32
  }
  func.func @transform_2(%arg0: i32, %arg1: i32) -> (i32, i32, i32) {
    %c1_i32 = arith.constant 1 : i32
    %0 = arith.subi %arg1, %c1_i32 : i32
    %c0_i32 = arith.constant 0 : i32
    %1 = arith.maxsi %0, %c0_i32 : i32
    %c0_i32_0 = arith.constant 0 : i32
    %c0_i32_1 = arith.constant 0 : i32
    %c0_i32_2 = arith.constant 0 : i32
    return %1, %c0_i32_0, %c0_i32_1 : i32, i32, i32
  }
  func.func @transform_3(%arg0: i32, %arg1: i32) -> (i32, i32) {
    %c0_i32 = arith.constant 0 : i32
    %c0_i32_0 = arith.constant 0 : i32
    %c0_i32_1 = arith.constant 0 : i32
    return %c0_i32, %c0_i32_0 : i32, i32
  }
  func.func @transform_4(%arg0: i32, %arg1: i32) -> (i32, i32) {
    %c0_i32 = arith.constant 0 : i32
    %c0_i32_0 = arith.constant 0 : i32
    return %arg0, %c0_i32 : i32, i32
  }
}

</mosaic_0001>

<bundles_post_ra>
// kernel: rnn_forward.1
= control target key start
LH: loop header
LB: loop body
LE: loop exit
PB: predicated region body
PF: predicated region fallthrough
CT: control target
= control target key end

     0   :  { %9 = vsyncpa [#allocation4], 0  ;;  %s1140_s0 = inlined_call_operand.vmem [shape: bf16[8,16], index: 0, kind: input, shape index: {}]   ;;  %s1141_s1 = inlined_call_operand.vmem [shape: bf16[16,128], index: 1, kind: input, shape index: {}]   ;;  %s1142_s2 = inlined_call_operand.hbm [shape: bf16[1,128,128], index: 2, kind: input, shape index: {}]   ;;  %s1143_s3 = inlined_call_operand.hbm [shape: bf16[128,128], index: 3, kind: input, shape index: {}]   ;;  %s1144_s4 = inlined_call_operand.vmem [shape: f32[8,128], index: 4, kind: output, shape index: {}]  }
   0x1   :  { %11 = vsyncpa [#allocation4 + $0x1], 0 }
   0x2   :  { %12 = vsyncpa [#allocation6], 0  ;;  %s996_s15 = smov 0   ;;  %s998_s16 = smov 0  }
   0x3   :  { %s1000_s17 = smov 0   ;;  %s1002_s18 = smov 0  }
   0x4   :  { %s1004_s19 = smov 0  }
   0x5 LB: > { %s650_s20 = sadd.s32 4294967295, %s959_s19   ;;  %p103_p0 = scmp.ne.s32.totalorder %s947_s16, %s943_s15  ;;  %s959_s19 = sphi %s1004_s19, %s18_s19   ;;  %s955_s18 = sphi %s1002_s18, %s1161_s18   ;;  %s951_s17 = sphi %s1000_s17, %s1160_s17   ;;  %s947_s16 = sphi %s998_s16, %s1130_s16   ;;  %s943_s15 = sphi %s996_s15, %s1159_s15  }
   0x6   : > { %p1021_p1 = scmp.eq.s32.totalorder %s650_s20, 0  ;;  %p653_p2 = scmp.ge.s32.totalorder %s959_s19, 1 }
   0x7   : > { %p161_p3 = scmp.lt.s32.totalorder %s959_s19, 3  ;;  %s961_s24 = smov [#allocation5]  }
   0x8   : > { %s1150_s21 = scalar_select %p1021_p1, 1, 0 }
   0x9   : > { %p1029_p4 = por %p1021_p1, %p103_p0  ;;  %p1033_p5 = pnand %p653_p2, %p161_p3 }
   0xa   : > { %s183_s25 = sshll.u32 %s961_s24, 4  ;;  %s27_s27 = sadd.s32 1, %s955_s18  ;;  %s184_s25 = int_to_ptr.vmem [resolvable:$true] %s183_s25 }
   0xb   : > { %s1151_s22 = scalar_select %p1029_p4, 1, 0 }
   0xc   : > { %s1152_s23 = scalar_select %p1033_p5, 1, 0 }
   0xd   : > { %p761_p6 = pneg %p1033_p5  ;;  %s850_s30 = scalar_lea.hbm %s1143_s3, 1024 }
   0xe   : > { %p851_p8 = scmp.ne.s32.totalorder %s1143_s3, %s850_s30  ;;  %p857_p12 = scmp.lt.u32.totalorder %s850_s30, %s1143_s3 }
   0xf   : > { %p1041_p7 = pnand %p761_p6, %p1021_p1 }
  0x11   : > { %p852_p9 = pneg %p1041_p7 }
  0x13   : > { %p853_p10 = pnand %p852_p9, %p851_p8 }
  0x15   : > { %p854_p11 = pneg %p853_p10 }
  0x17   : > { %p859_p13 = pnand %p857_p12, %p854_p11 }
  0x19   : > { %862 = shalt.err (!%p859_p13)
}
  0x1a   : > { %s863_s9 = scalar_lea.vmem %s184_s25, 1024  ;;  %p871_p6 = scmp.lt.s32.totalorder %s184_s25, %s184_s25 }
  0x1b   : > { %p864_p0 = scmp.ne.s32.totalorder %s184_s25, %s863_s9  ;;  %p872_p1 = scmp.lt.s32.totalorder %s863_s9, %s863_s9 }
  0x1d   : > { %p866_p2 = pnand %p864_p0, %p852_p9  ;;  %p873_p4 = por %p872_p1, %p871_p6 }
  0x1f   : > { %p867_p3 = pneg %p866_p2 }
  0x21   : > { %p874_p5 = pnand %p873_p4, %p867_p3 }
  0x23   : > { %877 = shalt.err (!%p874_p5)
}
  0x24   : > { %s962_s10 = smov 64   ;;  %s963_s11 = smov 4  }
  0x25   : > { %764 = dma.hbm_to_vmem [thread:$0]  (!%p1041_p7), %s1143_s3, 1024, %s184_s25, [#allocation6], %s962_s10, %s962_s10, %s963_s11  }
  0x26   : > { %p28_p8 = scmp.ge.s32.totalorder %s27_s27, 2  ;;  %p940_p1 = scmp.ne.s32.totalorder %s947_s16, 0 }
  0x27   : > { %p98_p4 = scmp.eq.s32.totalorder %s959_s19, 0  ;;  %p770_p9 = scmp.lt.s32.totalorder %s959_s19, 2 }
  0x28   : > { %s1163_s27 = smov (%p28_p8, %s27_s27), 0  ;;  %s964_s14 = smov [#allocation3]  }
  0x29   : > { %p99_p5 = por %p940_p1, %p98_p4  ;;  %s211_s15 = sshll.u32 %s964_s14, 4  ;;  %s212_s15 = int_to_ptr.vmem [resolvable:$true] %s211_s15 }
  0x2a   : > { %s878_s28 = scalar_lea.hbm %s1142_s2, 1024 }
  0x2b   : > { %p1070_p10 = pnand %p770_p9, %p99_p5  ;;  %p879_p7 = scmp.ne.s32.totalorder %s1142_s2, %s878_s28 }
  0x2c   : > { %p885_p0 = scmp.lt.u32.totalorder %s878_s28, %s878_s28  ;;  %p887_p2 = scmp.lt.u32.totalorder %s878_s28, %s1142_s2 }
  0x2d   : > { %s1154_s20 = scalar_select %p1070_p10, 1, 0 }
  0x2e   : > { %p880_p11 = pneg %p1070_p10  ;;  %p888_p3 = por %p887_p2, %p885_p0 }
  0x30   : > { %p881_p12 = pnand %p880_p11, %p879_p7 }
  0x32   : > { %p882_p13 = pneg %p881_p12 }
  0x34   : > { %p889_p6 = pnand %p888_p3, %p882_p13 }
  0x36   : > { %892 = shalt.err (!%p889_p6)
}
  0x37   : > { %s893_s6 = scalar_lea.vmem %s212_s15, 1024  ;;  %s900_s7 = scalar_lea.vmem %s212_s15, 2048 }
  0x38   : > { %p894_p8 = scmp.ne.s32.totalorder %s212_s15, %s893_s6  ;;  %p901_p5 = scmp.lt.s32.totalorder %s212_s15, %s212_s15 }
  0x39   : > { %p902_p9 = scmp.lt.s32.totalorder %s900_s7, %s893_s6 }
  0x3a   : > { %p896_p1 = pnand %p894_p8, %p880_p11 }
  0x3b   : > { %p903_p10 = por %p902_p9, %p901_p5 }
  0x3c   : > { %p897_p4 = pneg %p896_p1 }
  0x3e   : > { %p904_p7 = pnand %p903_p10, %p897_p4 }
  0x40   : > { %907 = shalt.err (!%p904_p7)
}
  0x41   : > { %p1155_p12 = scmp.ne.s32.totalorder %s1154_s20, 0  ;;  %p1156_p13 = scmp.ne.s32.totalorder %s1152_s23, 0 }
  0x42   : > { %s225_s12 = sand.u32 (!%p1156_p13), 1, %s947_s16   ;;  %p1157_p10 = scmp.ne.s32.totalorder (!%p1156_p13), %s1151_s22, 0 }
  0x43   : > { %768 = dma.hbm_to_vmem [thread:$0]  (!%p1155_p12), %s1142_s2, 1024, %s212_s15, [#allocation4], %s962_s10, %s962_s10, %s963_s11  }
  0x44   : > { %223 = sbr.rel (%p1156_p13) target bundleno = 816 (0x330), region = 36  ;;  %s662_s13 = sshll.u32 (!%p1156_p13), %s225_s12, 6 }
  0x45   : > { %s226_s14 = scalar_lea.sflag (!%p1156_p13), [#allocation4], %s225_s12  ;;  %s1096_s24 = scalar_lea.vmem (!%p1156_p13), [#allocation3], %s662_s13 }
  0x4b   : > { %933 = dma.done.wait (%p1157_p10), %s226_s14, 1024  }
  0x4c   : > { %935 = vsyncadd (%p1157_p10), %s226_s14, 4294966272  ;;  %p1158_p11 = scmp.ne.s32.totalorder %s1150_s21, 0 }
  0x4e   : > { %937 = dma.done.wait (%p1158_p11), [#allocation6], 1024  }
  0x4f   : > { %939 = vsyncadd (%p1158_p11), [#allocation6], 4294966272  ;;  %p664_p0 = scmp.ne.s32.totalorder %s951_s17, 0 }
  0x50   : > { %v829_v0 = vld [vmem:[%s1141_s1] sm:$0xff] (!%p664_p0)   ;;  %v965_v1 = vmov (!%p664_p0), 0.0   ;;  %vm966_vm0 = vmmov (!%p664_p0), 0   ;;  %vm286_vm1 = vcmask (!%p664_p0), 130048  }
  0x51   : > { %276 = sbr.rel (%p664_p0) target bundleno = 309 (0x135), region = 48  ;;  %709 = vmatprep.subr.bf16.mxu0 (!%p664_p0), %v965_v1  ;;  %711 = vmatprep.mubr.msk.bf16.mxu0 (!%p664_p0), %vm966_vm0, %v965_v1  ;;  %v277_v2 = vld [vmem:[%s1140_s0] sm:$0xf] (!%p664_p0) }
  0x52   : > { %710 = vmatpush3.bf16.msra.mxu0 (!%p664_p0), %v829_v0 }
  0x55   : > { %712 = vmatmul.mubr.msk.bf16.vlgmr.msra.gmra.mrb[0].mxu0 (!%p664_p0), %vm286_vm1, %v277_v2 }
 0x128   : > { %v324_v3 = vpop.f32.mrb[0].mxu0 }
 0x129   : > { %830 = vtanh.f32 %v324_v3  ;;  %v713_v4 = vpop.f32.mrb[1].mxu0 }
 0x12a   : > { %v327_v5 = vpop.f32.mrb[2].mxu0 }
 0x12b   : > { %v714_v6 = vpop.f32.mrb[3].mxu0 }
 0x133   : > { %v831_v7 = vpop.eup %830 }
 0x134   : > { %331 = vst [vmem:[#allocation2] sm:$0xff] %v831_v7 }
 0x135 PF: > { %p667_p2 = scmp.le.s32.totalorder %s951_s17, 0 }
 0x136   : > { %v832_v8 = vld [vmem:[%s1096_s24] sm:$0xff] (!%p667_p2)   ;;  %v967_v9 = vmov (!%p667_p2), 0.0   ;;  %v833_v10 = vld [vmem:[%s1096_s24 + $0x8] sm:$0xff] (!%p667_p2)   ;;  %vm968_vm2 = vmmov (!%p667_p2), 0   ;;  %v834_v11 = vld [vmem:[%s1096_s24 + $0x10] sm:$0xff] (!%p667_p2)  }
 0x137   : > { %335 = sbr.rel (%p667_p2) target bundleno = 567 (0x237), region = 52  ;;  %715 = vmatprep.subr.bf16.mxu0 (!%p667_p2), %v967_v9  ;;  %731 = vmatprep.mubr.msk.bf16.mxu0 (!%p667_p2), %vm968_vm2, %v967_v9  ;;  %v835_v12 = vld [vmem:[%s1096_s24 + $0x18] sm:$0xff] (!%p667_p2)   ;;  %v836_v13 = vld [vmem:[%s1096_s24 + $0x20] sm:$0xff] (!%p667_p2)   ;;  %v837_v14 = vld [vmem:[%s1096_s24 + $0x28] sm:$0xff] (!%p667_p2)  }
 0x138   : > { %716 = vmatpush3.bf16.msra.mxu0 (!%p667_p2), %v832_v8  ;;  %v838_v15 = vld [vmem:[%s1096_s24 + $0x30] sm:$0xff] (!%p667_p2)   ;;  %v839_v16 = vld [vmem:[%s1096_s24 + $0x38] sm:$0xff] (!%p667_p2)  }
 0x139   : > { %717 = vmatprep.subr.bf16.mxu0 (!%p667_p2), %v967_v9 }
 0x13b   : > { %v336_v17 = vld [vmem:[#allocation2] sm:$0xff] (!%p667_p2) }
 0x13c   : > { %718 = vmatpush3.bf16.msra.mxu0 (!%p667_p2), %v833_v10  ;;  %v337_v18 = vpack.c.bf16 (!%p667_p2), %v336_v17, %v336_v17 }
 0x13d   : > { %719 = vmatprep.subr.bf16.mxu0 (!%p667_p2), %v967_v9 }
 0x140   : > { %720 = vmatpush3.bf16.msra.mxu0 %v834_v11 }
 0x141   : > { %721 = vmatprep.subr.bf16.mxu0 %v967_v9 }
 0x144   : > { %722 = vmatpush3.bf16.msra.mxu0 %v835_v12 }
 0x145   : > { %723 = vmatprep.subr.bf16.mxu0 %v967_v9 }
 0x148   : > { %724 = vmatpush3.bf16.msra.mxu0 %v836_v13 }
 0x149   : > { %725 = vmatprep.subr.bf16.mxu0 %v967_v9 }
 0x14c   : > { %726 = vmatpush3.bf16.msra.mxu0 %v837_v14 }
 0x14d   : > { %727 = vmatprep.subr.bf16.mxu0 %v967_v9 }
 0x150   : > { %728 = vmatpush3.bf16.msra.mxu0 %v838_v15 }
 0x151   : > { %729 = vmatprep.subr.bf16.mxu0 %v967_v9 }
 0x154   : > { %730 = vmatpush3.bf16.msra.mxu0 %v839_v16 }
 0x157   : > { %732 = vmatmul.mubr.bf16.vlgmr.msra.gmra.mrb[0].mxu0 %v337_v18 }
 0x22a   : > { %v436_v19 = vpop.f32.mrb[0].mxu0 }
 0x22b   : > { %840 = vtanh.f32 %v436_v19  ;;  %v733_v20 = vpop.f32.mrb[1].mxu0 }
 0x22c   : > { %v439_v21 = vpop.f32.mrb[2].mxu0 }
 0x22d   : > { %v734_v22 = vpop.f32.mrb[3].mxu0 }
 0x235   : > { %v841_v23 = vpop.eup %840 }
 0x236   : > { %443 = vst [vmem:[#allocation2] sm:$0xff] %v841_v23 }
 0x237 PF: > { %p676_p3 = scmp.ne.s32.totalorder %s951_s17, 1 }
 0x238   : > { %v842_v24 = vld [vmem:[#allocation5] sm:$0xff] (!%p676_p3)   ;;  %v969_v25 = vmov (!%p676_p3), 0.0   ;;  %v843_v26 = vld [vmem:[#allocation5 + $0x8] sm:$0xff] (!%p676_p3)   ;;  %vm970_vm3 = vmmov (!%p676_p3), 0   ;;  %v844_v27 = vld [vmem:[#allocation5 + $0x10] sm:$0xff] (!%p676_p3)  }
 0x239   : > { %447 = sbr.rel (%p676_p3) target bundleno = 816 (0x330), region = 56  ;;  %735 = vmatprep.subr.bf16.mxu0 (!%p676_p3), %v969_v25  ;;  %751 = vmatprep.mubr.msk.bf16.mxu0 (!%p676_p3), %vm970_vm3, %v969_v25  ;;  %v845_v28 = vld [vmem:[#allocation5 + $0x18] sm:$0xff] (!%p676_p3)   ;;  %v846_v29 = vld [vmem:[#allocation5 + $0x20] sm:$0xff] (!%p676_p3)   ;;  %v847_v30 = vld [vmem:[#allocation5 + $0x28] sm:$0xff] (!%p676_p3)  }
 0x23a   : > { %736 = vmatpush3.bf16.msra.mxu0 (!%p676_p3), %v842_v24  ;;  %v848_v31 = vld [vmem:[#allocation5 + $0x30] sm:$0xff] (!%p676_p3)   ;;  %v849_v32 = vld [vmem:[#allocation5 + $0x38] sm:$0xff] (!%p676_p3)  }
 0x23b   : > { %737 = vmatprep.subr.bf16.mxu0 (!%p676_p3), %v969_v25 }
 0x23d   : > { %v448_v33 = vld [vmem:[#allocation2] sm:$0xff] (!%p676_p3) }
 0x23e   : > { %738 = vmatpush3.bf16.msra.mxu0 (!%p676_p3), %v843_v26  ;;  %v449_v34 = vpack.c.bf16 (!%p676_p3), %v448_v33, %v448_v33 }
 0x23f   : > { %739 = vmatprep.subr.bf16.mxu0 (!%p676_p3), %v969_v25 }
 0x242   : > { %740 = vmatpush3.bf16.msra.mxu0 %v844_v27 }
 0x243   : > { %741 = vmatprep.subr.bf16.mxu0 %v969_v25 }
 0x246   : > { %742 = vmatpush3.bf16.msra.mxu0 %v845_v28 }
 0x247   : > { %743 = vmatprep.subr.bf16.mxu0 %v969_v25 }
 0x24a   : > { %744 = vmatpush3.bf16.msra.mxu0 %v846_v29 }
 0x24b   : > { %745 = vmatprep.subr.bf16.mxu0 %v969_v25 }
 0x24e   : > { %746 = vmatpush3.bf16.msra.mxu0 %v847_v30 }
 0x24f   : > { %747 = vmatprep.subr.bf16.mxu0 %v969_v25 }
 0x252   : > { %748 = vmatpush3.bf16.msra.mxu0 %v848_v31 }
 0x253   : > { %749 = vmatprep.subr.bf16.mxu0 %v969_v25 }
 0x256   : > { %750 = vmatpush3.bf16.msra.mxu0 %v849_v32 }
 0x259   : > { %752 = vmatmul.mubr.bf16.vlgmr.msra.gmra.mrb[0].mxu0 %v449_v34 }
 0x32c   : > { %v548_v35 = vpop.f32.mrb[0].mxu0 }
 0x32d   : > { %554 = vst [vmem:[%s1144_s4] sm:$0xff] %v548_v35  ;;  %v753_v36 = vpop.f32.mrb[1].mxu0 }
 0x32e   : > { %v551_v37 = vpop.f32.mrb[2].mxu0 }
 0x32f   : > { %v754_v38 = vpop.f32.mrb[3].mxu0 }
 0x330 PF: > { %s18_s19 = sadd.s32 1, %s959_s19   ;;  %s1159_s15 = smov %s947_s16 }
 0x331   : > { %p15_p6 = scmp.ge.s32.totalorder %s18_s19, 4   ;;  %s1130_s16 = smov 0  }
 0x332   : > { %s1160_s17 = smov %s955_s18  ;;  %s1161_s18 = smov %s1163_s27 }
 0x333   :  { %17 = sbr.rel (!%p15_p6) target bundleno = 5 (0x5), region = 95 }
 0x33a   :  { %574 = vsyncpa [#allocation4], 1 }
 0x33b   :  { %576 = vsyncpa [#allocation4 + $0x1], 1 }
 0x33c   :  { %577 = vsyncpa [#allocation6], 1 }

</bundles_post_ra>
